<compile_context>
chip_gen: v7x
topology: tpu7x:2x2x1
jax: 0.10.0
libtpu: 0.0.40
codegen_flags: <defaults>
</compile_context>

<pallas_src>
import math

import jax
import jax.numpy as jnp
from jax.experimental import pallas as pl
from jax.experimental.pallas import tpu as pltpu


# ---------------------------------------------------------------------------
# Kernels
# ---------------------------------------------------------------------------

def _support_kernel(x_ref, w_ref, s_ref):
    # support = X @ W : bf16 operands, f32 MXU accumulation, stored bf16.
    s_ref[...] = jnp.dot(
        x_ref[...], w_ref[...], preferred_element_type=jnp.float32
    ).astype(s_ref.dtype)


def _aggregate_kernel(adj_ref, s_ref, o_ref, acc_ref):
    # output = A @ support : K-tiled reduction with an f32 accumulator.
    @pl.when(pl.program_id(1) == 0)
    def _():
        acc_ref[...] = jnp.zeros_like(acc_ref)

    acc_ref[...] += jnp.dot(
        adj_ref[...], s_ref[...], preferred_element_type=jnp.float32
    )

    @pl.when(pl.program_id(1) == pl.num_programs(1) - 1)
    def _():
        o_ref[...] = acc_ref[...].astype(o_ref.dtype)


def _aggregate_bias_kernel(adj_ref, s_ref, b_ref, o_ref, acc_ref):
    # Same as above with the bias add fused into the f32 epilogue.
    @pl.when(pl.program_id(1) == 0)
    def _():
        acc_ref[...] = jnp.zeros_like(acc_ref)

    acc_ref[...] += jnp.dot(
        adj_ref[...], s_ref[...], preferred_element_type=jnp.float32
    )

    @pl.when(pl.program_id(1) == pl.num_programs(1) - 1)
    def _():
        o_ref[...] = (acc_ref[...] + b_ref[...]).astype(o_ref.dtype)


# TODO(synk): optional BatchNorm1d branch (batch_norm=True) is not exercised by
# the module defaults; it would be a fused f32 scale/shift on the last-k step.


# ---------------------------------------------------------------------------
# Wrapper helpers
# ---------------------------------------------------------------------------

def _vmem_limit_bytes():
    try:
        cap = pltpu.get_tpu_info().vmem_capacity_bytes
    except Exception:
        cap = 64 << 20  # conservative (v7x-class) fallback
    # ~75% of physical VMEM: 48 MiB on 64 MiB chips (v7x), 96 MiB on 128 MiB
    # chips (v5e / v6e).
    return min(int(cap * 3 // 4), 112 << 20)


def _pick_tile(n):
    """MXU-friendly tile (multiple of 128, <= 512) that divides n if possible."""
    for t in (512, 384, 256, 128):
        if t <= n and n % t == 0:
            return t
    if n <= 512:
        return -(-n // 128) * 128   # one (padded) tile
    return 512                      # pad n up to a multiple of 512


def _support_row_tile(n_pad, tk, cap=2048):
    """Coarser row tile for the cheap support matmul (a multiple of tk)."""
    ts, m = tk, tk
    while m <= min(n_pad, cap):
        if n_pad % m == 0:
            ts = m
        m += tk
    return ts


def _pad2(a, rows, cols, dtype):
    """Cast and (only if actually needed) zero-pad a 2-D array to (rows, cols)."""
    a = a.astype(dtype)
    r, c = a.shape
    if r == rows and c == cols:
        return a
    return jnp.zeros((rows, cols), dtype).at[:r, :c].set(a)


# ---------------------------------------------------------------------------
# GCN layer forward
# ---------------------------------------------------------------------------

def gcn_layer(x, adj, weight, bias=None):
    """x: [N, in_feats], adj: [N, N], weight: [in_feats, n_hidden] -> [N, n_hidden]."""
    n, in_feats = x.shape
    n_hidden = weight.shape[1]

    h_pad = max(128, ((n_hidden + 127) // 128) * 128)   # lane-dense output
    t = _pick_tile(n)                  # row tile == K tile (128-aligned)
    n_pad = -(-n // t) * t
    ts = _support_row_tile(n_pad, t)   # coarser tile for the cheap X @ W

    # bf16 operands; zero padding (only when t does not divide n) is inert.
    x_p = _pad2(x, n_pad, in_feats, jnp.bfloat16)
    adj_p = _pad2(adj, n_pad, n_pad, jnp.bfloat16)   # no pad copy when t | n
    w_p = _pad2(weight, in_feats, h_pad, jnp.bfloat16)

    vmem_limit = _vmem_limit_bytes()
    cparams_sup = pltpu.CompilerParams(
        dimension_semantics=("parallel",),
        vmem_limit_bytes=vmem_limit,
    )
    cparams_agg = pltpu.CompilerParams(
        dimension_semantics=("parallel", "arbitrary"),
        vmem_limit_bytes=vmem_limit,
    )

    # Kernel 1: support = X @ W -> bf16 [n_pad, h_pad] (computed once, reused).
    support = pl.pallas_call(
        _support_kernel,
        out_shape=jax.ShapeDtypeStruct((n_pad, h_pad), jnp.bfloat16),
        grid=(n_pad // ts,),
        in_specs=[
            pl.BlockSpec((ts, in_feats), lambda i: (i, 0)),
            pl.BlockSpec((in_feats, h_pad), lambda i: (0, 0)),
        ],
        out_specs=pl.BlockSpec((ts, h_pad), lambda i: (i, 0)),
        compiler_params=cparams_sup,
    )(x_p, w_p)

    # Kernel 2: output = A @ support (+ bias), K-tiled reduction.
    grid = (n_pad // t, n_pad // t)
    adj_spec = pl.BlockSpec((t, t), lambda i, k: (i, k))      # streamed
    sup_spec = pl.BlockSpec((t, h_pad), lambda i, k: (k, 0))  # streamed over k
    out_spec = pl.BlockSpec((t, h_pad), lambda i, k: (i, 0))  # resident over k
    scratch = [pltpu.VMEM((t, h_pad), jnp.float32)]

    if bias is None:
        out = pl.pallas_call(
            _aggregate_kernel,
            out_shape=jax.ShapeDtypeStruct((n_pad, h_pad), jnp.float32),
            grid=grid,
            in_specs=[adj_spec, sup_spec],
            out_specs=out_spec,
            scratch_shapes=scratch,
            compiler_params=cparams_agg,
        )(adj_p, support)
    else:
        b_p = jnp.zeros((1, h_pad), jnp.float32).at[0, :n_hidden].set(
            bias.astype(jnp.float32))
        out = pl.pallas_call(
            _aggregate_bias_kernel,
            out_shape=jax.ShapeDtypeStruct((n_pad, h_pad), jnp.float32),
            grid=grid,
            in_specs=[adj_spec, sup_spec,
                      pl.BlockSpec((1, h_pad), lambda i, k: (0, 0))],
            out_specs=out_spec,
            scratch_shapes=scratch,
            compiler_params=cparams_agg,
        )(adj_p, support, b_p)

    return out[:n, :n_hidden].astype(x.dtype)


def xavier_uniform(key, shape, dtype=jnp.float32):
    fan_in, fan_out = shape
    bound = math.sqrt(6.0 / (fan_in + fan_out))
    return jax.random.uniform(key, shape, dtype, minval=-bound, maxval=bound)


if __name__ == "__main__":
    N, IN_FEATS, N_HIDDEN = 128, 64, 32

    key = jax.random.PRNGKey(0)
    k_x, k_adj, k_w = jax.random.split(key, 3)

    x = jax.random.normal(k_x, (N, IN_FEATS), dtype=jnp.float32)

    # Symmetric row-normalized adjacency (deterministic, synthetic graph).
    a = (jax.random.uniform(k_adj, (N, N)) > 0.9).astype(jnp.float32)
    a = jnp.maximum(a, a.T) + jnp.eye(N, dtype=jnp.float32)  # add self-loops
    deg = jnp.sum(a, axis=1, keepdims=True)
    adj = a / deg

    weight = xavier_uniform(k_w, (IN_FEATS, N_HIDDEN))

    out = gcn_layer(x, adj, weight)
    out = jax.block_until_ready(out)
    assert out.shape == (N, N_HIDDEN)

    # Reference 1: same numerics as the kernel (bf16 operands, f32 accumulate).
    xb = x.astype(jnp.bfloat16).astype(jnp.float32)
    ab = adj.astype(jnp.bfloat16).astype(jnp.float32)
    wb = weight.astype(jnp.bfloat16).astype(jnp.float32)
    sb = (xb @ wb).astype(jnp.bfloat16).astype(jnp.float32)
    ref_bf16 = ab @ sb
    assert jnp.allclose(out, ref_bf16, atol=1e-3, rtol=1e-3)

    # Reference 2: pure-f32 PyTorch forward (loose tolerance for bf16 operands).
    ref_f32 = adj @ (x @ weight)
    assert jnp.allclose(out, ref_f32, atol=5e-2, rtol=5e-2)

    print("KERNEL_OK")
</pallas_src>

<mosaic_0001>
module attributes {stable_mosaic.version = 11 : i64} {
  func.func @_support_kernel(%arg0: i32, %arg1: memref<128x64xbf16, #tpu.memory_space<vmem>>, %arg2: memref<64x128xbf16, #tpu.memory_space<vmem>>, %arg3: memref<128x128xbf16, #tpu.memory_space<vmem>>) attributes {dimension_semantics = [#tpu.dimension_semantics<parallel>], iteration_bounds = array<i64: 1>, scalar_prefetch = 0 : i64, scratch_operands = 0 : i64, tpu.core_type = #tpu.core_type<tc>, window_params = [{transform_indices = @transform_0, window_bounds = array<i64: 128, 64>}, {pipeline_mode = #tpu.pipeline_mode<synchronous>, transform_indices = @transform_1, window_bounds = array<i64: 64, 128>}, {transform_indices = @transform_2, window_bounds = array<i64: 128, 128>}]} {
    %c0 = arith.constant 0 : index
    %c0_0 = arith.constant 0 : index
    %0 = vector.load %arg1[%c0, %c0_0] : memref<128x64xbf16, #tpu.memory_space<vmem>>, vector<128x64xbf16>
    %c0_1 = arith.constant 0 : index
    %c0_2 = arith.constant 0 : index
    %1 = vector.load %arg2[%c0_1, %c0_2] : memref<64x128xbf16, #tpu.memory_space<vmem>>, vector<64x128xbf16>
    %cst = arith.constant dense<0.000000e+00> : vector<128x128xf32>
    %2 = tpu.matmul %0, %1, %cst {dimension_numbers = #tpu.dot_dimension_numbers<[1], [0], [0], [1], [0, 0, 1, 1], [], []>} : vector<128x64xbf16>, vector<64x128xbf16>, vector<128x128xf32> -> vector<128x128xf32>
    %3 = arith.truncf %2 : vector<128x128xf32> to vector<128x128xbf16>
    %c0_3 = arith.constant 0 : index
    %c0_4 = arith.constant 0 : index
    %4 = vector.load %arg3[%c0_3, %c0_4] : memref<128x128xbf16, #tpu.memory_space<vmem>>, vector<128x128xbf16>
    tpu.vector_store %arg3[%c0_3, %c0_4], %3 {strides = array<i32>} : memref<128x128xbf16, #tpu.memory_space<vmem>>, vector<128x128xbf16>,
    return
  }
  func.func @transform_0(%arg0: i32) -> (i32, i32) {
    %c0_i32 = arith.constant 0 : i32
    %c0_i32_0 = arith.constant 0 : i32
    return %arg0, %c0_i32 : i32, i32
  }
  func.func @transform_1(%arg0: i32) -> (i32, i32) {
    %c0_i32 = arith.constant 0 : i32
    %c0_i32_0 = arith.constant 0 : i32
    %c0_i32_1 = arith.constant 0 : i32
    return %c0_i32, %c0_i32_0 : i32, i32
  }
  func.func @transform_2(%arg0: i32) -> (i32, i32) {
    %c0_i32 = arith.constant 0 : i32
    %c0_i32_0 = arith.constant 0 : i32
    return %arg0, %c0_i32 : i32, i32
  }
}

</mosaic_0001>

<bundles_post_ra>
// kernel: tpu_custom_call.1
= control target key start
LH: loop header
LB: loop body
LE: loop exit
PB: predicated region body
PF: predicated region fallthrough
CT: control target
= control target key end

     0   :  { %vm101_vm0 = vcmask 523264   ;;  %s575_s0 = inlined_call_operand.vmem [shape: bf16[128,64], index: 0, kind: input, shape index: {}]   ;;  %s576_s1 = inlined_call_operand.vmem [shape: bf16[64,128], index: 1, kind: input, shape index: {}]   ;;  %s577_s2 = inlined_call_operand.hbm [shape: bf16[128,128], index: 2, kind: output, shape index: {}]  }
   0x1   :  { %v465_v0 = vld [vmem:[%s576_s1] sm:$0xff]   ;;  %v466_v1 = vld [vmem:[%s576_s1 + $0x8] sm:$0xff]   ;;  %v467_v2 = vld [vmem:[%s576_s1 + $0x10] sm:$0xff]  }
   0x2   :  { %430 = vmatprep.subr.bf16.mxu0 %v465_v0  ;;  %454 = vmatprep.subr.bf16.mxu1 %v465_v0  ;;  %v469_v3 = vld [vmem:[%s575_s0] sm:$0xff]   ;;  %v468_v5 = vld [vmem:[%s576_s1 + $0x18] sm:$0xff]  }
   0x3   :  { %431 = vmatpush3.bf16.msra.mxu0 %v465_v0  ;;  %458 = vmatpush3.bf16.msra.mxu1 %v465_v0  ;;  %v470_v4 = vld [vmem:[%s575_s0 + $0x20] sm:$0xff]  }
   0x4   :  { %432 = vmatprep.subr.bf16.mxu0 %v466_v1  ;;  %455 = vmatprep.subr.bf16.mxu1 %v466_v1 }
   0x5   :  { %438 = vmatprep.mubr.msk.bf16.mxu0 %vm101_vm0, %v469_v3  ;;  %446 = vmatprep.mubr.msk.bf16.mxu1 %vm101_vm0, %v470_v4 }
   0x7   :  { %433 = vmatpush3.bf16.msra.mxu0 %v466_v1  ;;  %459 = vmatpush3.bf16.msra.mxu1 %v466_v1 }
   0x8   :  { %434 = vmatprep.subr.bf16.mxu0 %v467_v2  ;;  %456 = vmatprep.subr.bf16.mxu1 %v467_v2 }
   0xb   :  { %435 = vmatpush3.bf16.msra.mxu0 %v467_v2  ;;  %460 = vmatpush3.bf16.msra.mxu1 %v467_v2 }
   0xc   :  { %436 = vmatprep.subr.bf16.mxu0 %v468_v5  ;;  %457 = vmatprep.subr.bf16.mxu1 %v468_v5 }
   0xd   :  { %7 = vsyncpa [#allocation3], 0  ;;  %v471_v6 = vld [vmem:[%s575_s0 + $0x8] sm:$0xff]   ;;  %v473_v8 = vld [vmem:[%s575_s0 + $0x10] sm:$0xff]  }
   0xe   :  { %v472_v7 = vld [vmem:[%s575_s0 + $0x28] sm:$0xff]   ;;  %v474_v9 = vld [vmem:[%s575_s0 + $0x30] sm:$0xff]   ;;  %v475_v10 = vld [vmem:[%s575_s0 + $0x18] sm:$0xff]  }
   0xf   :  { %437 = vmatpush3.bf16.msra.mxu0 %v468_v5  ;;  %461 = vmatpush3.bf16.msra.mxu1 %v468_v5  ;;  %v476_v11 = vld [vmem:[%s575_s0 + $0x38] sm:$0xff]   ;;  %s501_s0 = smov [#allocation2]  }
  0x10   :  { %s308_s4 = sshll.u32 %s501_s0, 4  ;;  %s309_s4 = int_to_ptr.vmem [resolvable:$true] %s308_s4 }
  0x11   :  { %s477_s5 = scalar_lea.vmem %s309_s4, 1024  ;;  %p482_p1 = scmp.lt.s32.totalorder %s309_s4, %s309_s4 }
  0x12   :  { %439 = vmatmul.mubr.msk.bf16.vlgmr.msra.gmra.mrb[0].mxu0 %vm101_vm0, %v471_v6  ;;  %447 = vmatmul.mubr.msk.bf16.vlgmr.msra.gmra.mrb[0].mxu1 %vm101_vm0, %v472_v7  ;;  %p478_p0 = scmp.ne.s32.totalorder %s309_s4, %s477_s5  ;;  %p483_p2 = scmp.lt.s32.totalorder %s477_s5, %s477_s5 }
  0x13   :  { %442 = vmatprep.mubr.msk.bf16.mxu0 %vm101_vm0, %v473_v8  ;;  %450 = vmatprep.mubr.msk.bf16.mxu1 %vm101_vm0, %v474_v9 }
  0x14   :  { %p484_p3 = por %p483_p2, %p482_p1 }
  0x16   :  { %p485_p4 = pnand %p484_p3, %p478_p0 }
  0x1a   :  { %443 = vmatmul.mubr.msk.bf16.gmra.mrb[4].mxu0 %vm101_vm0, %v475_v10  ;;  %451 = vmatmul.mubr.msk.bf16.gmra.mrb[4].mxu1 %vm101_vm0, %v476_v11 }
  0xe5   :  { %v440_v12 = vpop.f32.mrb[0].mxu0  ;;  %v448_v13 = vpop.f32.mrb[0].mxu1 }
  0xe6   :  { %v160_v14 = vpop.f32.mrb[1].mxu0  ;;  %v192_v15 = vpop.f32.mrb[1].mxu1 }
  0xe7   :  { %v441_v16 = vpop.f32.mrb[2].mxu0  ;;  %v449_v17 = vpop.f32.mrb[2].mxu1 }
  0xe8   :  { %v379_v18 = vpack.c.bf16 %v441_v16, %v440_v12  ;;  %v399_v19 = vpack.c.bf16 %v449_v17, %v448_v13  ;;  %v163_v20 = vpop.f32.mrb[3].mxu0  ;;  %v195_v21 = vpop.f32.mrb[3].mxu1 }
  0xe9   :  { %v374_v22 = vpack.c.bf16 %v163_v20, %v160_v14  ;;  %v394_v23 = vpack.c.bf16 %v195_v21, %v192_v15 }
  0xea   :  { %411 = vst [vmem:[#allocation2 + $0x8] sm:$0xff] %v379_v18   ;;  %415 = vst [vmem:[#allocation2 + $0x28] sm:$0xff] %v399_v19  }
  0xeb   :  { %375 = vst [vmem:[#allocation2] sm:$0xff] %v374_v22   ;;  %414 = vst [vmem:[#allocation2 + $0x20] sm:$0xff] %v394_v23  }
  0xed   :  { %v444_v24 = vpop.f32.mrb[4].mxu0  ;;  %v452_v25 = vpop.f32.mrb[4].mxu1 }
  0xee   :  { %v176_v26 = vpop.f32.mrb[5].mxu0  ;;  %v208_v27 = vpop.f32.mrb[5].mxu1 }
  0xef   :  { %v445_v28 = vpop.f32.mrb[6].mxu0  ;;  %v453_v29 = vpop.f32.mrb[6].mxu1 }
  0xf0   :  { %v389_v30 = vpack.c.bf16 %v445_v28, %v444_v24  ;;  %v409_v31 = vpack.c.bf16 %v453_v29, %v452_v25  ;;  %v179_v32 = vpop.f32.mrb[7].mxu0  ;;  %v211_v33 = vpop.f32.mrb[7].mxu1 }
  0xf1   :  { %v384_v34 = vpack.c.bf16 %v179_v32, %v176_v26  ;;  %v404_v35 = vpack.c.bf16 %v211_v33, %v208_v27 }
  0xf2   :  { %413 = vst [vmem:[#allocation2 + $0x18] sm:$0xff] %v389_v30   ;;  %417 = vst [vmem:[#allocation2 + $0x38] sm:$0xff] %v409_v31  }
  0xf3   :  { %412 = vst [vmem:[#allocation2 + $0x10] sm:$0xff] %v384_v34   ;;  %416 = vst [vmem:[#allocation2 + $0x30] sm:$0xff] %v404_v35  }
  0xf4   :  { %488 = shalt.err (!%p485_p4)
}
  0xf5   :  { %s489_s8 = scalar_lea.hbm %s577_s2, 1024 }
  0xf6   :  { %p490_p5 = scmp.ne.s32.totalorder %s577_s2, %s489_s8  ;;  %p493_p6 = scmp.lt.u32.totalorder %s489_s8, %s577_s2 }
  0xf8   :  { %p495_p7 = pnand %p493_p6, %p490_p5 }
  0xfa   :  { %498 = shalt.err (!%p495_p7)
}
  0xfb   :  { %s502_s13 = smov 64   ;;  %s503_s14 = smov 4  }
  0xfc   :  { %314 = dma.vmem_to_hbm [thread:$0]  %s309_s4, 1024, %s577_s2, [#allocation3], %s502_s13, %s502_s13, %s503_s14  }
  0xfd   :  { %499 = dma.done.wait [#allocation3], 1024  }
  0xfe   :  { %500 = vsyncadd [#allocation3], 4294966272 }
  0xff   :  { %318 = vsyncpa [#allocation3], 1 }

</bundles_post_ra>
